<compile_context>
chip_gen: v7x
topology: tpu7x:2x2x1
jax: 0.10.0
libtpu: 0.0.40
codegen_flags: <defaults>
</compile_context>

<pallas_src>
from functools import partial

import jax
import jax.numpy as jnp
from jax.experimental import pallas as pl
from jax.experimental.pallas import tpu as pltpu

LANE = 128


# --------------------------------------------------------------------------- #
# Kernels (one "pass" = one stream over the N^2 adjacency, row-block tiled)
# --------------------------------------------------------------------------- #
def _gcn_lpa_pass1_kernel(a_ref, dinv_ref, x_ref, s_ref, w0_ref, b0_ref,
                          h_ref, lab_ref, *, sigmoid_lab):
    """Row block of:  h = relu((A_n X) W0 + b0)   and   lab = A_n S."""
    a = a_ref[...]                                    # (TM, N)   bf16/f32
    dinv = dinv_ref[...]                              # (TM, 1)   f32
    # GCN layer 0, reassociated: (A_n @ X) @ W0  (deg_inv folded after A@X).
    axn = dinv * jnp.dot(a, x_ref[...], preferred_element_type=jnp.float32)
    h = jnp.dot(axn, w0_ref[...], preferred_element_type=jnp.float32) + b0_ref[...]
    h_ref[...] = jnp.maximum(h, 0.0).astype(h_ref.dtype)
    # LPA step 1 on the same (already loaded) adjacency block.
    lab = dinv * jnp.dot(a, s_ref[...], preferred_element_type=jnp.float32)
    if sigmoid_lab:
        lab = jax.nn.sigmoid(lab)
    lab_ref[...] = lab.astype(lab_ref.dtype)


def _gcn_lpa_pass2_kernel(a_ref, dinv_ref, h_ref, lab_in_ref, w1_ref, b1_ref,
                          y_ref, lab_ref, *, sigmoid_lab):
    """Row block of:  y = sigmoid((A_n h) W1 + b1)   and   lab = A_n lab_in."""
    a = a_ref[...]
    dinv = dinv_ref[...]
    ahn = dinv * jnp.dot(a, h_ref[...], preferred_element_type=jnp.float32)
    y = jnp.dot(ahn, w1_ref[...], preferred_element_type=jnp.float32) + b1_ref[...]
    y_ref[...] = jax.nn.sigmoid(y).astype(y_ref.dtype)
    # LPA step 2 on the same adjacency block.
    lab = dinv * jnp.dot(a, lab_in_ref[...], preferred_element_type=jnp.float32)
    if sigmoid_lab:
        lab = jax.nn.sigmoid(lab)
    lab_ref[...] = lab.astype(lab_ref.dtype)


def _lpa_step_kernel(a_ref, dinv_ref, lab_in_ref, lab_ref, *, sigmoid_lab):
    """Row block of one extra label-propagation step: lab = A_n lab_in."""
    lab = dinv_ref[...] * jnp.dot(a_ref[...], lab_in_ref[...],
                                  preferred_element_type=jnp.float32)
    if sigmoid_lab:
        lab = jax.nn.sigmoid(lab)
    lab_ref[...] = lab.astype(lab_ref.dtype)


# --------------------------------------------------------------------------- #
# Wrapper
# --------------------------------------------------------------------------- #
def _pad_lanes(x, width=LANE):
    rows, cols = x.shape
    if cols == width:
        return x
    return jnp.pad(x, ((0, 0), (0, width - cols)))


def _pick_row_tile(n, itemsize, requested=None, budget_bytes=16 * 1024 * 1024):
    """Largest row tile that divides n, is a multiple of 8, and keeps the
    double-buffered (tm, n) adjacency block within `budget_bytes`."""
    if (requested is not None and requested <= n and n % requested == 0
            and (requested % 8 == 0 or requested == n)):
        return requested
    for tm in (1024, 512, 256, 128, 64, 32, 16, 8):
        if tm <= n and n % tm == 0 and 2 * tm * n * itemsize <= budget_bytes:
            return tm
    return n


def gcn_lpa_forward(x, soft_labels, edge_index, edge_attr, params, lpa_iter,
                    row_tile=None, use_bf16=True):
    """Build dense weighted adjacency from COO edges, run the tiled passes."""
    N = x.shape[0]
    w0, b0, w1, b1 = params
    c_out = w1.shape[1]
    n_cls = soft_labels.shape[1]

    # SparseTensor(row, col, value) -> dense, duplicates summed; exact f32
    # row-degree inverse computed once (deg_inv == 0 where deg == 0).
    a = jnp.zeros((N, N), jnp.float32).at[edge_index[0], edge_index[1]].add(
        edge_attr.astype(jnp.float32))
    deg = jnp.sum(a, axis=1, keepdims=True)
    dinv = jnp.where(deg > 0.0, 1.0 / deg, 0.0)                 # (N, 1) f32

    # bf16 adjacency / node operands for the MXU, f32 weights & elementwise.
    cdt = jnp.bfloat16 if use_bf16 else jnp.float32
    a_c = a.astype(cdt)
    xp = _pad_lanes(x.astype(jnp.float32)).astype(cdt)          # (N, 128)
    sp = _pad_lanes(soft_labels.astype(jnp.float32)).astype(cdt)
    w0p = jnp.zeros((LANE, LANE), jnp.float32).at[:w0.shape[0], :w0.shape[1]].set(w0)
    w1p = jnp.zeros((LANE, LANE), jnp.float32).at[:w1.shape[0], :w1.shape[1]].set(w1)
    b0p = _pad_lanes(jnp.reshape(b0, (1, -1)).astype(jnp.float32))
    b1p = _pad_lanes(jnp.reshape(b1, (1, -1)).astype(jnp.float32))

    tm = _pick_row_tile(N, jnp.dtype(cdt).itemsize, row_tile)
    grid = (N // tm,)
    cparams = pltpu.CompilerParams(
        dimension_semantics=("parallel",),
        vmem_limit_bytes=48 * 1024 * 1024,   # fits every generation (v7x = 64 MiB)
    )

    a_spec = pl.BlockSpec((tm, N), lambda i: (i, 0))
    dinv_spec = pl.BlockSpec((tm, 1), lambda i: (i, 0))
    resident = pl.BlockSpec((N, LANE), lambda i: (0, 0))        # stays in VMEM
    w_spec = pl.BlockSpec((LANE, LANE), lambda i: (0, 0))
    b_spec = pl.BlockSpec((1, LANE), lambda i: (0, 0))
    row_out = pl.BlockSpec((tm, LANE), lambda i: (i, 0))

    # ---- pass 1: GCN layer 0 + LPA step 1 (one stream over A) ----
    sig1 = lpa_iter == 1
    hp, lab = pl.pallas_call(
        partial(_gcn_lpa_pass1_kernel, sigmoid_lab=sig1),
        grid=grid,
        in_specs=[a_spec, dinv_spec, resident, resident, w_spec, b_spec],
        out_specs=(row_out, row_out),
        out_shape=(
            jax.ShapeDtypeStruct((N, LANE), cdt),
            jax.ShapeDtypeStruct((N, LANE), jnp.float32 if sig1 else cdt),
        ),
        compiler_params=cparams,
    )(a_c, dinv, xp, sp, w0p, b0p)

    # ---- pass 2: GCN layer 1 + LPA step 2 (one stream over A) ----
    sig2 = lpa_iter == 2
    lab_in2 = lab if lpa_iter >= 2 else sp       # lab result unused if lpa_iter < 2
    yp, lab2 = pl.pallas_call(
        partial(_gcn_lpa_pass2_kernel, sigmoid_lab=sig2),
        grid=grid,
        in_specs=[a_spec, dinv_spec, resident, resident, w_spec, b_spec],
        out_specs=(row_out, row_out),
        out_shape=(
            jax.ShapeDtypeStruct((N, LANE), jnp.float32),
            jax.ShapeDtypeStruct((N, LANE), jnp.float32 if sig2 else cdt),
        ),
        compiler_params=cparams,
    )(a_c, dinv, hp, lab_in2, w1p, b1p)
    if lpa_iter >= 2:
        lab = lab2

    # ---- remaining LPA steps (3..lpa_iter), one stream over A each ----
    for step in range(3, lpa_iter + 1):
        is_last = step == lpa_iter
        lab = pl.pallas_call(
            partial(_lpa_step_kernel, sigmoid_lab=is_last),
            grid=grid,
            in_specs=[a_spec, dinv_spec, resident],
            out_specs=row_out,
            out_shape=jax.ShapeDtypeStruct(
                (N, LANE), jnp.float32 if is_last else cdt),
            compiler_params=cparams,
        )(a_c, dinv, lab)

    y = yp[:, :c_out]
    if lpa_iter == 0:
        labels = jax.nn.sigmoid(soft_labels.astype(jnp.float32))  # loop ran 0 times
    else:
        labels = lab[:, :n_cls].astype(jnp.float32)
    return y, labels


if __name__ == "__main__":
    key = jax.random.PRNGKey(0)
    N, C_IN, C_HID, C_OUT = 64, 16, 32, 8   # in/hidden/out channels
    NUM_CLASSES = 8                          # soft_labels width
    NUM_EDGES = 256
    LPA_ITER = 3

    k = jax.random.split(key, 6)
    x = jax.random.normal(k[0], (N, C_IN), jnp.float32)
    soft_labels = jax.nn.softmax(
        jax.random.normal(k[1], (N, NUM_CLASSES), jnp.float32), axis=-1)
    edge_index = jax.random.randint(k[2], (2, NUM_EDGES), 0, N, dtype=jnp.int32)
    # self.edge_attr = Parameter(G.edge_weights.abs()) -> deterministic |normal|
    edge_attr = jnp.abs(jax.random.normal(k[3], (NUM_EDGES,), jnp.float32))

    # GCNConv weights (deterministic scaled-normal init) and biases.
    w0 = jax.random.normal(k[4], (C_IN, C_HID), jnp.float32) / jnp.sqrt(float(C_IN))
    b0 = jnp.zeros((1, C_HID), jnp.float32)
    w1 = jax.random.normal(k[5], (C_HID, C_OUT), jnp.float32) / jnp.sqrt(float(C_HID))
    b1 = jnp.zeros((1, C_OUT), jnp.float32)

    # row_tile=32 -> grid of 2 row blocks, exercising the tiled pipeline.
    y, labels = gcn_lpa_forward(x, soft_labels, edge_index, edge_attr,
                                (w0, b0, w1, b1), LPA_ITER, row_tile=32)
    jax.block_until_ready((y, labels))

    assert y.shape == (N, C_OUT) and labels.shape == (N, NUM_CLASSES)
    assert bool(jnp.all(jnp.isfinite(y))) and bool(jnp.all(jnp.isfinite(labels)))
    # sigmoid outputs must lie in (0, 1)
    assert bool(jnp.all((y > 0) & (y < 1))) and bool(jnp.all((labels > 0) & (labels < 1)))
    print("KERNEL_OK")
</pallas_src>

<mosaic_0001>
module attributes {stable_mosaic.version = 11 : i64} {
  func.func @_gcn_lpa_pass1_kernel(%arg0: i32, %arg1: memref<32x64xbf16, #tpu.memory_space<vmem>>, %arg2: memref<32x1xf32, #tpu.memory_space<vmem>>, %arg3: memref<64x128xbf16, #tpu.memory_space<vmem>>, %arg4: memref<64x128xbf16, #tpu.memory_space<vmem>>, %arg5: memref<128x128xf32, #tpu.memory_space<vmem>>, %arg6: memref<1x128xf32, #tpu.memory_space<vmem>>, %arg7: memref<32x128xbf16, #tpu.memory_space<vmem>>, %arg8: memref<32x128xbf16, #tpu.memory_space<vmem>>) attributes {dimension_semantics = [#tpu.dimension_semantics<parallel>], iteration_bounds = array<i64: 2>, scalar_prefetch = 0 : i64, scratch_operands = 0 : i64, tpu.core_type = #tpu.core_type<tc>, window_params = [{transform_indices = @transform_0, window_bounds = array<i64: 32, 64>}, {transform_indices = @transform_1, window_bounds = array<i64: 32, 1>}, {pipeline_mode = #tpu.pipeline_mode<synchronous>, transform_indices = @transform_2, window_bounds = array<i64: 64, 128>}, {pipeline_mode = #tpu.pipeline_mode<synchronous>, transform_indices = @transform_3, window_bounds = array<i64: 64, 128>}, {pipeline_mode = #tpu.pipeline_mode<synchronous>, transform_indices = @transform_4, window_bounds = array<i64: 128, 128>}, {pipeline_mode = #tpu.pipeline_mode<synchronous>, transform_indices = @transform_5, window_bounds = array<i64: 1, 128>}, {transform_indices = @transform_6, window_bounds = array<i64: 32, 128>}, {transform_indices = @transform_7, window_bounds = array<i64: 32, 128>}]} {
    %c0 = arith.constant 0 : index
    %c0_0 = arith.constant 0 : index
    %0 = vector.load %arg1[%c0, %c0_0] : memref<32x64xbf16, #tpu.memory_space<vmem>>, vector<32x64xbf16>
    %c0_1 = arith.constant 0 : index
    %c0_2 = arith.constant 0 : index
    %1 = vector.load %arg2[%c0_1, %c0_2] : memref<32x1xf32, #tpu.memory_space<vmem>>, vector<32x1xf32>
    %c0_3 = arith.constant 0 : index
    %c0_4 = arith.constant 0 : index
    %2 = vector.load %arg3[%c0_3, %c0_4] : memref<64x128xbf16, #tpu.memory_space<vmem>>, vector<64x128xbf16>
    %cst = arith.constant dense<0.000000e+00> : vector<32x128xf32>
    %3 = tpu.matmul %0, %2, %cst {dimension_numbers = #tpu.dot_dimension_numbers<[1], [0], [0], [1], [0, 0, 1, 1], [], []>} : vector<32x64xbf16>, vector<64x128xbf16>, vector<32x128xf32> -> vector<32x128xf32>
    %4 = vector.broadcast %1 : vector<32x1xf32> to vector<32x128xf32>
    %5 = arith.mulf %4, %3 : vector<32x128xf32>
    %c0_5 = arith.constant 0 : index
    %c0_6 = arith.constant 0 : index
    %6 = vector.load %arg5[%c0_5, %c0_6] : memref<128x128xf32, #tpu.memory_space<vmem>>, vector<128x128xf32>
    %cst_7 = arith.constant dense<0.000000e+00> : vector<32x128xf32>
    %7 = tpu.matmul %5, %6, %cst_7 {dimension_numbers = #tpu.dot_dimension_numbers<[1], [0], [0], [1], [0, 0, 1, 1], [], []>} : vector<32x128xf32>, vector<128x128xf32>, vector<32x128xf32> -> vector<32x128xf32>
    %c0_8 = arith.constant 0 : index
    %c0_9 = arith.constant 0 : index
    %8 = vector.load %arg6[%c0_8, %c0_9] : memref<1x128xf32, #tpu.memory_space<vmem>>, vector<1x128xf32>
    %9 = vector.broadcast %8 : vector<1x128xf32> to vector<32x128xf32>
    %10 = arith.addf %7, %9 : vector<32x128xf32>
    %cst_10 = arith.constant 0.000000e+00 : f32
    %11 = vector.broadcast %cst_10 : f32 to vector<32x128xf32>
    %12 = arith.maximumf %10, %11 : vector<32x128xf32>
    %13 = arith.truncf %12 : vector<32x128xf32> to vector<32x128xbf16>
    %c0_11 = arith.constant 0 : index
    %c0_12 = arith.constant 0 : index
    %14 = vector.load %arg7[%c0_11, %c0_12] : memref<32x128xbf16, #tpu.memory_space<vmem>>, vector<32x128xbf16>
    tpu.vector_store %arg7[%c0_11, %c0_12], %13 {strides = array<i32>} : memref<32x128xbf16, #tpu.memory_space<vmem>>, vector<32x128xbf16>,
    %c0_13 = arith.constant 0 : index
    %c0_14 = arith.constant 0 : index
    %15 = vector.load %arg4[%c0_13, %c0_14] : memref<64x128xbf16, #tpu.memory_space<vmem>>, vector<64x128xbf16>
    %cst_15 = arith.constant dense<0.000000e+00> : vector<32x128xf32>
    %16 = tpu.matmul %0, %15, %cst_15 {dimension_numbers = #tpu.dot_dimension_numbers<[1], [0], [0], [1], [0, 0, 1, 1], [], []>} : vector<32x64xbf16>, vector<64x128xbf16>, vector<32x128xf32> -> vector<32x128xf32>
    %17 = vector.broadcast %1 : vector<32x1xf32> to vector<32x128xf32>
    %18 = arith.mulf %17, %16 : vector<32x128xf32>
    %19 = arith.truncf %18 : vector<32x128xf32> to vector<32x128xbf16>
    %c0_16 = arith.constant 0 : index
    %c0_17 = arith.constant 0 : index
    %20 = vector.load %arg8[%c0_16, %c0_17] : memref<32x128xbf16, #tpu.memory_space<vmem>>, vector<32x128xbf16>
    tpu.vector_store %arg8[%c0_16, %c0_17], %19 {strides = array<i32>} : memref<32x128xbf16, #tpu.memory_space<vmem>>, vector<32x128xbf16>,
    return
  }
  func.func @transform_0(%arg0: i32) -> (i32, i32) {
    %c0_i32 = arith.constant 0 : i32
    %c0_i32_0 = arith.constant 0 : i32
    return %arg0, %c0_i32 : i32, i32
  }
  func.func @transform_1(%arg0: i32) -> (i32, i32) {
    %c0_i32 = arith.constant 0 : i32
    %c0_i32_0 = arith.constant 0 : i32
    return %arg0, %c0_i32 : i32, i32
  }
  func.func @transform_2(%arg0: i32) -> (i32, i32) {
    %c0_i32 = arith.constant 0 : i32
    %c0_i32_0 = arith.constant 0 : i32
    %c0_i32_1 = arith.constant 0 : i32
    return %c0_i32, %c0_i32_0 : i32, i32
  }
  func.func @transform_3(%arg0: i32) -> (i32, i32) {
    %c0_i32 = arith.constant 0 : i32
    %c0_i32_0 = arith.constant 0 : i32
    %c0_i32_1 = arith.constant 0 : i32
    return %c0_i32, %c0_i32_0 : i32, i32
  }
  func.func @transform_4(%arg0: i32) -> (i32, i32) {
    %c0_i32 = arith.constant 0 : i32
    %c0_i32_0 = arith.constant 0 : i32
    %c0_i32_1 = arith.constant 0 : i32
    return %c0_i32, %c0_i32_0 : i32, i32
  }
  func.func @transform_5(%arg0: i32) -> (i32, i32) {
    %c0_i32 = arith.constant 0 : i32
    %c0_i32_0 = arith.constant 0 : i32
    %c0_i32_1 = arith.constant 0 : i32
    return %c0_i32, %c0_i32_0 : i32, i32
  }
  func.func @transform_6(%arg0: i32) -> (i32, i32) {
    %c0_i32 = arith.constant 0 : i32
    %c0_i32_0 = arith.constant 0 : i32
    return %arg0, %c0_i32 : i32, i32
  }
  func.func @transform_7(%arg0: i32) -> (i32, i32) {
    %c0_i32 = arith.constant 0 : i32
    %c0_i32_0 = arith.constant 0 : i32
    return %arg0, %c0_i32 : i32, i32
  }
}

</mosaic_0001>

<bundles_post_ra>
// kernel: tpu_custom_call.1
= control target key start
LH: loop header
LB: loop body
LE: loop exit
PB: predicated region body
PF: predicated region fallthrough
CT: control target
= control target key end

     0   :  { %13 = vsyncpa [#allocation3], 0  ;;  %s1617_s0 = inlined_call_operand.vmem [shape: bf16[64,64], index: 0, kind: input, shape index: {}]   ;;  %s1618_s1 = inlined_call_operand.vmem [shape: f32[64,1], index: 1, kind: input, shape index: {}]   ;;  %s1619_s2 = inlined_call_operand.vmem [shape: bf16[64,128], index: 2, kind: input, shape index: {}]   ;;  %s1620_s3 = inlined_call_operand.hbm [shape: bf16[64,128], index: 3, kind: input, shape index: {}]   ;;  %s1621_s4 = inlined_call_operand.hbm [shape: f32[128,128], index: 4, kind: input, shape index: {}]   ;;  %s1622_s5 = inlined_call_operand.vmem [shape: f32[1,128], index: 5, kind: input, shape index: {}]   ;;  %s1623_s6 = inlined_call_operand.hbm [shape: bf16[64,128], index: 6, kind: output, shape index: {0}]   ;;  %s1624_s7 = inlined_call_operand.hbm [shape: bf16[64,128], index: 7, kind: output, shape index: {1}]  }
   0x1   :  { %14 = vsyncpa [#allocation6], 0 }
   0x2   :  { %15 = vsyncpa [#allocation4], 0 }
   0x3   :  { %17 = vsyncpa [#allocation4 + $0x1], 0 }
   0x4   :  { %18 = vsyncpa [#allocation9], 0 }
   0x5   :  { %20 = vsyncpa [#allocation9 + $0x1], 0  ;;  %s1373_s24 = smov 0   ;;  %s1375_s25 = smov 0  }
   0x6   :  { %s1377_s26 = smov 0   ;;  %s1379_s27 = smov 0  }
   0x7 LB: > { %s1394_s28 = sadd.s32 4294967295, %s1320_s27   ;;  %s875_s29 = sadd.s32 4294967294, %s1320_s27   ;;  %s1320_s27 = sphi %s1379_s27, %s1644_s27   ;;  %s1316_s26 = sphi %s1377_s26, %s1643_s26   ;;  %s1312_s25 = sphi %s1375_s25, %s1642_s25   ;;  %s1308_s24 = sphi %s1373_s24, %s1641_s24  }
   0x8   : > { %s1398_s30 = sadd.s32 1, %s1320_s27   ;;  %s169_s8 = sadd.s32 1, %s1316_s26 }
   0x9   : > { %s166_s9 = ssub.s32 %s1320_s27, %s1398_s30  ;;  %p179_p0 = scmp.ne.s32.totalorder %s1316_s26, %s1312_s25 }
   0xa   : > { %p167_p1 = scmp.eq.s32.totalorder %s166_s9, 0  ;;  %p180_p2 = scmp.eq.s32.totalorder %s1394_s28, 1 }
   0xb   : > { %p185_p3 = scmp.ne.s32.totalorder %s1312_s25, %s1308_s24  ;;  %p186_p4 = scmp.eq.s32.totalorder %s875_s29, 1 }
   0xc   : > { %s1409_s10 = scalar_select %p167_p1, %s1316_s26, %s169_s8  }
   0xd   : > { %p1411_p5 = por %p180_p2, %p179_p0  ;;  %p1415_p6 = por %p186_p4, %p185_p3 }
   0xe   : > { %1628 = sst [smem:[#allocation14_spill]] %s1409_s10  ;;  %p876_p7 = scmp.ge.s32.totalorder %s1320_s27, 1 }
   0xf   : > { %s1629_s11 = scalar_select %p1411_p5, 1, 0 }
  0x10   : > { %s1630_s12 = scalar_select %p1415_p6, 1, 0 }
  0x11   : > { %p219_p8 = scmp.lt.s32.totalorder %s1320_s27, 3  ;;  %p1625_p9 = scmp.eq.s32.totalorder %s1394_s28, 0 }
  0x12   : > { %s1322_s14 = smov [#allocation2]   ;;  %s1323_s17 = smov [#allocation5]  }
  0x13   : > { %p1422_p10 = pnand %p876_p7, %p219_p8  ;;  %s234_s15 = sshll.u32 %s1322_s14, 4  ;;  %s235_s15 = int_to_ptr.vmem [resolvable:$true] %s234_s15 }
  0x14   : > { %s247_s18 = sshll.u32 %s1323_s17, 4  ;;  %s1162_s21 = scalar_lea.hbm %s1620_s3, 512  ;;  %s1434_s18 = int_to_ptr.vmem [resolvable:$true] %s247_s18 }
  0x15   : > { %s1631_s13 = scalar_select %p1422_p10, 1, 0 }
  0x16   : > { %p1090_p11 = pneg %p1422_p10  ;;  %p1163_p13 = scmp.ne.s32.totalorder %s1620_s3, %s1162_s21 }
  0x17   : > { %p1169_p3 = scmp.lt.u32.totalorder %s1162_s21, %s1620_s3 }
  0x18   : > { %p1430_p12 = pnand %p1625_p9, %p1090_p11 }
  0x1a   : > { %p1164_p0 = pneg %p1430_p12 }
  0x1c   : > { %p1165_p1 = pnand %p1164_p0, %p1163_p13 }
  0x1e   : > { %p1166_p2 = pneg %p1165_p1 }
  0x20   : > { %p1171_p4 = pnand %p1169_p3, %p1166_p2 }
  0x22   : > { %1174 = shalt.err (!%p1171_p4)
}
  0x23   : > { %s1175_s9 = scalar_lea.vmem %s235_s15, 512  ;;  %p1183_p9 = scmp.lt.s32.totalorder %s235_s15, %s235_s15 }
  0x24   : > { %p1176_p7 = scmp.ne.s32.totalorder %s235_s15, %s1175_s9  ;;  %p1184_p6 = scmp.lt.s32.totalorder %s1175_s9, %s1175_s9 }
  0x26   : > { %p1178_p8 = pnand %p1176_p7, %p1164_p0  ;;  %p1185_p5 = por %p1184_p6, %p1183_p9 }
  0x28   : > { %p1179_p11 = pneg %p1178_p8 }
  0x2a   : > { %p1186_p10 = pnand %p1185_p5, %p1179_p11 }
  0x2c   : > { %1189 = shalt.err (!%p1186_p10)
}
  0x2d   : > { %s1324_s14 = smov 64   ;;  %s1325_s17 = smov 4  }
  0x2e   : > { %1093 = dma.hbm_to_vmem [thread:$0]  (!%p1430_p12), %s1620_s3, 512, %s235_s15, [#allocation3], %s1324_s14, %s1324_s14, %s1325_s17  }
  0x2f   : > { %s1190_s23 = scalar_lea.hbm %s1621_s4, 2048 }
  0x30   : > { %p1191_p13 = scmp.ne.s32.totalorder %s1621_s4, %s1190_s23  ;;  %p1197_p9 = scmp.lt.u32.totalorder %s1190_s23, %s1621_s4 }
  0x32   : > { %p1193_p5 = pnand %p1191_p13, %p1164_p0 }
  0x34   : > { %p1194_p6 = pneg %p1193_p5 }
  0x36   : > { %p1199_p10 = pnand %p1197_p9, %p1194_p6 }
  0x38   : > { %1202 = shalt.err (!%p1199_p10)
}
  0x39   : > { %s1203_s15 = scalar_lea.vmem %s1434_s18, 2048  ;;  %p1211_p4 = scmp.lt.s32.totalorder %s1434_s18, %s1434_s18 }
  0x3a   : > { %p1204_p1 = scmp.ne.s32.totalorder %s1434_s18, %s1203_s15  ;;  %p1212_p7 = scmp.lt.s32.totalorder %s1203_s15, %s1203_s15 }
  0x3c   : > { %p1206_p2 = pnand %p1204_p1, %p1164_p0  ;;  %p1213_p8 = por %p1212_p7, %p1211_p4 }
  0x3e   : > { %p1207_p3 = pneg %p1206_p2 }
  0x40   : > { %p1214_p11 = pnand %p1213_p8, %p1207_p3 }
  0x42   : > { %1217 = shalt.err (!%p1214_p11)
}
  0x43   : > { %s1326_s10 = smov 128   ;;  %s1327_s14 = smov 8  }
  0x44   : > { %1096 = dma.hbm_to_vmem [thread:$0]  (!%p1430_p12), %s1621_s4, 2048, %s1434_s18, [#allocation6], %s1326_s10, %s1326_s10, %s1327_s14  }
  0x45   : > { %p1633_p13 = scmp.ne.s32.totalorder %s1631_s13, 0 }
  0x46   : > { %p1634_p0 = scmp.eq.s32.totalorder (!%p1633_p13), %s1394_s28, 0 }
  0x47   : > { %284 = sbr.rel (%p1633_p13) target bundleno = 554 (0x22a), region = 44 }
  0x4e   : > { %1291 = dma.done.wait (%p1634_p0), [#allocation3], 512   ;;  %p1635_p5 = pmov %p1634_p0 }
  0x4f   : > { %p1636_p6 = pmov %p1634_p0 }
  0x50   : > { %1293 = vsyncadd (%p1635_p5), [#allocation3], 4294966784 }
  0x51   : > { %1295 = dma.done.wait (%p1636_p6), [#allocation6], 2048   ;;  %p1637_p9 = pmov %p1634_p0 }
  0x52   : > { %s885_s16 = sshll.u32 %s1394_s28, 2  ;;  %v1328_v0 = vmov 0   ;;  %v1152_v1 = vld [vmem:[%s1619_s2] sm:$0xff]   ;;  %v1153_v2 = vld [vmem:[%s1619_s2 + $0x8] sm:$0xff]   ;;  %v1154_v3 = vld [vmem:[%s1619_s2 + $0x10] sm:$0xff]   ;;  %vm395_vm0 = vcmask 523264  }
  0x53   : > { %1297 = vsyncadd (%p1637_p9), [#allocation6], 4294965248  ;;  %p331_p10 = scmp.lt.s32.totalorder %s885_s16, 7  ;;  %1150 = vset.pattern.permute.xlu0 %v1328_v0  ;;  %1151 = vset.pattern.permute.xlu1 %v1328_v0  ;;  %v1155_v5 = vld [vmem:[%s1619_s2 + $0x18] sm:$0xff]   ;;  %v1158_v8 = vld [vmem:[#allocation2] sm:$0xff]   ;;  %s928_s23 = sshll.u32 %s1394_s28, 8 }
  0x54   : > { %984 = vmatprep.subr.bf16.mxu0 %v1152_v1  ;;  %v475_v9 = vld [vmem:[#allocation5] sm:$0xff]  ;;  %v476_v10 = vld [vmem:[#allocation5 + $0x8] sm:$0xff]  ;;  %v477_v13 = vld [vmem:[#allocation5 + $0x10] sm:$0xff]  ;;  %s1530_s9 = scalar_lea.hbm %s1624_s7, %s928_s23  ;;  %p1638_p1 = scmp.ne.s32.totalorder %s1629_s11, 0 }
  0x55   : > { %s1646_s16 = smov (!%p331_p10, %s885_s16), 7  ;;  %985 = vmatpush3.bf16.msra.mxu0 %v1152_v1  ;;  %v1046_v12 = vpack.c.bf16 %v476_v10, %v475_v9  ;;  %v478_v14 = vld [vmem:[#allocation5 + $0x18] sm:$0xff]  ;;  %v479_v18 = vld [vmem:[#allocation5 + $0x20] sm:$0xff]  ;;  %v480_v19 = vld [vmem:[#allocation5 + $0x28] sm:$0xff]  ;;  %s1329_s14 = smov [#allocation8]  }
  0x56   : > { %s886_s13 = sshll.u32 %s1646_s16, 2  ;;  %986 = vmatprep.subr.bf16.mxu0 %v1153_v2  ;;  %s888_s10 = sshll.u32 %s1646_s16, 3  ;;  %v1050_v17 = vpack.c.bf16 %v478_v14, %v477_v13  ;;  %v1159_v20 = vld [vmem:[#allocation2 + $0x8] sm:$0xff]   ;;  %v1054_v21 = vpack.c.bf16 %v480_v19, %v479_v18  ;;  %v481_v22 = vld [vmem:[#allocation5 + $0x30] sm:$0xff]  ;;  %v482_v23 = vld [vmem:[#allocation5 + $0x38] sm:$0xff] }
  0x57   : > { %s334_s8 = scalar_lea.vmem %s1617_s0, %s886_s13  ;;  %s340_s19 = scalar_lea.vmem %s1618_s1, %s888_s10  ;;  %1047 = vmatprep.subr.bf16.mxu1 %v1046_v12  ;;  %v1160_v24 = vld [vmem:[#allocation2 + $0x10] sm:$0xff]   ;;  %v1058_v25 = vpack.c.bf16 %v482_v23, %v481_v22  ;;  %v483_v26 = vld [vmem:[#allocation5 + $0x40] sm:$0xff]  ;;  %v484_v27 = vld [vmem:[#allocation5 + $0x48] sm:$0xff] }
  0x58   : > { %v1156_v4 = vld [vmem:[%s334_s8] sm:$0xff]   ;;  %v351_v7 = vld [vmem:[%s340_s19 + $0x10] sm:$0xff]  ;;  %v350_v11 = vld [vmem:[%s340_s19 + $0x8] sm:$0xff]  ;;  %1049 = vmatpush3.bf16.msra.mxu1 %v1046_v12  ;;  %v1062_v29 = vpack.c.bf16 %v484_v27, %v483_v26  ;;  %s1517_s16 = sand.u32 1, %s1312_s25   ;;  %s1222_s17 = sshll.u32 %s1329_s14, 4  ;;  %s1223_s17 = int_to_ptr.vmem [resolvable:$false] %s1222_s17 }
  0x59   : > { %992 = vmatprep.mubr.msk.bf16.mxu0 %vm395_vm0, %v1156_v4  ;;  %987 = vmatpush3.bf16.msra.mxu0 %v1153_v2  ;;  %v349_v6 = vld [vmem:[%s340_s19] sm:$0xff]  ;;  %v352_v15 = vld [vmem:[%s340_s19 + $0x18] sm:$0xff]  ;;  %v1157_v16 = vld [vmem:[%s334_s8 + $0x8] sm:$0xff]   ;;  %s883_s20 = sshll.u32 %s1517_s16, 4  ;;  %s718_s15 = scalar_lea.sflag [#allocation9], %s1517_s16 }
  0x5a   : > { %988 = vmatprep.subr.bf16.mxu0 %v1154_v3  ;;  %453 = vperm.xlu0 %1150, %v349_v6   ;;  %v1161_v28 = vld [vmem:[#allocation2 + $0x18] sm:$0xff]   ;;  %v485_v30 = vld [vmem:[#allocation5 + $0x50] sm:$0xff]  ;;  %v487_v33 = vld [vmem:[#allocation5 + $0x60] sm:$0xff]  ;;  %s329_s21 = scalar_lea.vmem [#allocation8], %s883_s20  ;;  %s1224_s19 = scalar_lea.vmem %s1223_s17, 512 }
  0x5b   : > { %463 = vperm.xlu1 %1151, %v351_v7   ;;  %1051 = vmatprep.subr.bf16.mxu1 %v1050_v17  ;;  %v486_v31 = vld [vmem:[#allocation5 + $0x58] sm:$0xff]  ;;  %v488_v34 = vld [vmem:[#allocation5 + $0x68] sm:$0xff]  ;;  %v489_v36 = vld [vmem:[#allocation5 + $0x70] sm:$0xff]  ;;  %s747_s22 = sshll.u32 %s329_s21, 4  ;;  %s1522_s22 = int_to_ptr.vmem [resolvable:$true] %s747_s22 }
  0x5c   : > { %1053 = vmatpush3.bf16.msra.mxu1 %v1050_v17  ;;  %v1066_v32 = vpack.c.bf16 %v486_v31, %v485_v30  ;;  %v1070_v35 = vpack.c.bf16 %v488_v34, %v487_v33  ;;  %v490_v37 = vld [vmem:[#allocation5 + $0x78] sm:$0xff]  ;;  %s1218_s10 = scalar_lea.vmem %s1522_s22, 256  ;;  %p1225_p4 = scmp.lt.s32.totalorder %s1522_s22, %s1223_s17 }
  0x5d   : > { %989 = vmatpush3.bf16.msra.mxu0 %v1154_v3  ;;  %1055 = vmatprep.subr.bf16.mxu1 %v1054_v21  ;;  %v1074_v38 = vpack.c.bf16 %v490_v37, %v489_v36  ;;  %p1219_p12 = scmp.ne.s32.totalorder %s1522_s22, %s1218_s10  ;;  %p1226_p7 = scmp.lt.s32.totalorder %s1224_s19, %s1218_s10 }
  0x5e   : > { %990 = vmatprep.subr.bf16.mxu0 %v1155_v5  ;;  %458 = vperm.xlu0 %1150, %v350_v11  }
  0x5f   : > { %468 = vperm.xlu1 %1151, %v352_v15   ;;  %p1220_p2 = pnand %p1219_p12, %p1638_p1  ;;  %p1227_p8 = por %p1226_p7, %p1225_p4 }
  0x60   : > { %1057 = vmatpush3.bf16.msra.mxu1 %v1054_v21 }
  0x61   : > { %991 = vmatpush3.bf16.msra.mxu0 %v1155_v5  ;;  %1059 = vmatprep.subr.bf16.mxu1 %v1058_v25  ;;  %p1221_p3 = pneg %p1220_p2 }
  0x62   : > { %1034 = vmatprep.subr.bf16.mxu0 %v1158_v8 }
  0x63   : > { %p1228_p11 = pnand %p1227_p8, %p1221_p3 }
  0x64   : > { %993 = vmatmul.mubr.msk.bf16.vlgmr.msra.gmra.mrb[0].mxu0 %vm395_vm0, %v1157_v16  ;;  %1061 = vmatpush3.bf16.msra.mxu1 %v1058_v25 }
  0x65   : > { %1035 = vmatpush3.bf16.msra.mxu0 %v1158_v8  ;;  %1042 = vmatprep.mubr.msk.bf16.mxu0 %vm395_vm0, %v1156_v4 }
  0x66   : > { %1036 = vmatprep.subr.bf16.mxu0 %v1159_v20  ;;  %1063 = vmatprep.subr.bf16.mxu1 %v1062_v29 }
  0x68   : > { %1065 = vmatpush3.bf16.msra.mxu1 %v1062_v29 }
  0x69   : > { %1037 = vmatpush3.bf16.msra.mxu0 %v1159_v20  ;;  %1067 = vmatprep.subr.bf16.mxu1 %v1066_v32 }
  0x6a   : > { %1038 = vmatprep.subr.bf16.mxu0 %v1160_v24 }
  0x6c   : > { %1069 = vmatpush3.bf16.msra.mxu1 %v1066_v32 }
  0x6d   : > { %1039 = vmatpush3.bf16.msra.mxu0 %v1160_v24  ;;  %1071 = vmatprep.subr.bf16.mxu1 %v1070_v35 }
  0x6e   : > { %1040 = vmatprep.subr.bf16.mxu0 %v1161_v28 }
  0x70   : > { %1073 = vmatpush3.bf16.msra.mxu1 %v1070_v35 }
  0x71   : > { %1041 = vmatpush3.bf16.msra.mxu0 %v1161_v28  ;;  %1075 = vmatprep.subr.bf16.mxu1 %v1074_v38 }
  0x74   : > { %1043 = vmatmul.mubr.msk.bf16.vlgmr.msra.gmra.mrb[4].mxu0 %vm395_vm0, %v1157_v16  ;;  %1077 = vmatpush3.bf16.msra.mxu1 %v1074_v38 }
  0xd9   : > { %v454_v39 = vpop.permute.xlu0 %453 }
  0xda   : > { %v464_v40 = vpop.permute.xlu1 %463 }
  0xdd   : > { %v459_v45 = vpop.permute.xlu0 %458 }
  0xde   : > { %v469_v49 = vpop.permute.xlu1 %468 }
 0x137   : > { %v994_v41 = vpop.f32.mrb[0].mxu0 }
 0x138   : > { %v436_v42 = vpop.f32.mrb[1].mxu0  ;;  %v473_v48 = vmul.f32 %v994_v41, %v464_v40 }
 0x139   : > { %v995_v43 = vpop.f32.mrb[2].mxu0  ;;  %v471_v44 = vmul.f32 %v454_v39, %v436_v42 }
 0x13a   : > { %v439_v46 = vpop.f32.mrb[3].mxu0  ;;  %v474_v50 = vmul.f32 %v995_v43, %v469_v49 }
 0x13b   : > { %v472_v47 = vmul.f32 %v459_v45, %v439_v46  ;;  %1028 = vmatprep.mubr.f32.mxu1 %v471_v44 }
 0x13d   : > { %1029 = vmatmul.mubr.f32.vlgmr.msra.gmra.mrb[0].mxu1 %v472_v47 }
 0x13e   : > { %1031 = vmatprep.mubr.f32.mxu1 %v473_v48 }
 0x141   : > { %1032 = vmatmul.mubr.f32.gmra.mrb[2].mxu1 %v474_v50 }
 0x147   : > { %v1044_v51 = vpop.f32.mrb[4].mxu0 }
 0x148   : > { %v673_v52 = vpop.f32.mrb[5].mxu0  ;;  %v690_v54 = vmul.f32 %v1044_v51, %v464_v40 }
 0x149   : > { %v1045_v53 = vpop.f32.mrb[6].mxu0  ;;  %v688_v57 = vmul.f32 %v673_v52, %v454_v39 }
 0x14a   : > { %v691_v55 = vmul.f32 %v1045_v53, %v469_v49  ;;  %v676_v56 = vpop.f32.mrb[7].mxu0 }
 0x14b   : > { %v689_v58 = vmul.f32 %v676_v56, %v459_v45 }
 0x14c   : > { %v948_v59 = vpack.c.bf16 %v691_v55, %v690_v54 }
 0x14d   : > { %v943_v60 = vpack.c.bf16 %v689_v58, %v688_v57 }
 0x14e   : > { %951 = vst [vmem:[%s329_s21 + $0x8] sm:$0xff] %v948_v59  }
 0x14f   : > { %944 = vst [vmem:[%s329_s21] sm:$0xff] %v943_v60  }
 0x150   : > { %1231 = shalt.err (!%p1228_p11)
}
 0x151   : > { %s1232_s18 = scalar_lea.hbm %s1530_s9, 256  ;;  %s1236_s29 = scalar_lea.hbm %s1624_s7, 512 }
 0x152   : > { %p1233_p13 = scmp.ne.s32.totalorder %s1530_s9, %s1232_s18  ;;  %p1237_p6 = scmp.lt.u32.totalorder %s1530_s9, %s1624_s7 }
 0x153   : > { %p1238_p9 = scmp.lt.u32.totalorder %s1236_s29, %s1232_s18  ;;  %p1240_p12 = scmp.lt.u32.totalorder %s1232_s18, %s1530_s9 }
 0x154   : > { %p1234_p0 = pnand %p1233_p13, %p1638_p1 }
 0x155   : > { %p1239_p10 = por %p1238_p9, %p1237_p6 }
 0x156   : > { %p1235_p5 = pneg %p1234_p0 }
 0x157   : > { %p1241_p2 = por %p1240_p12, %p1239_p10 }
 0x159   : > { %p1242_p3 = pnand %p1241_p2, %p1235_p5 }
 0x15b   : > { %1245 = shalt.err (!%p1242_p3)
}
 0x15c   : > { %s1330_s10 = smov 64   ;;  %s1331_s17 = smov 4   ;;  %v897_v61 = vld [vmem:[%s1622_s5] ss:$0 sm:$0xff] }
 0x15d   : > { %1087 = dma.vmem_to_hbm [thread:$0]  (%p1638_p1), %s1522_s22, 256, %s1530_s9, %s718_s15, %s1330_s10, %s1330_s10, %s1331_s17  }
 0x15e   : > { %s322_s22 = scalar_lea.vmem [#allocation7], %s883_s20  ;;  %s1571_s21 = scalar_lea.hbm %s1623_s6, %s928_s23 }
 0x15f   : > { %s731_s9 = sshll.u32 %s322_s22, 4  ;;  %s713_s29 = scalar_lea.sflag [#allocation4], %s1517_s16  ;;  %s1564_s9 = int_to_ptr.vmem [resolvable:$true] %s731_s9 }
 0x160   : > { %s1246_s8 = scalar_lea.vmem %s1564_s9, 256  ;;  %s1332_s20 = smov [#allocation7]  }
 0x161   : > { %p1247_p4 = scmp.ne.s32.totalorder %s1564_s9, %s1246_s8  ;;  %s1250_s14 = sshll.u32 %s1332_s20, 4  ;;  %s1251_s14 = int_to_ptr.vmem [resolvable:$false] %s1250_s14 }
 0x162   : > { %s1252_s19 = scalar_lea.vmem %s1251_s14, 512  ;;  %p1253_p11 = scmp.lt.s32.totalorder %s1564_s9, %s1251_s14 }
 0x163   : > { %p1248_p7 = pnand %p1247_p4, %p1638_p1  ;;  %p1254_p13 = scmp.lt.s32.totalorder %s1252_s19, %s1246_s8 }
 0x165   : > { %p1249_p8 = pneg %p1248_p7  ;;  %p1255_p0 = por %p1254_p13, %p1253_p11 }
 0x167   : > { %p1256_p5 = pnand %p1255_p0, %p1249_p8 }
 0x210   : > { %v1030_v62 = vpop.f32.mrb[0].mxu1 }
 0x211   : > { %v570_v63 = vadd.f32 %v1030_v62, %v897_v61  ;;  %v564_v0 = vpop.f32.mrb[1].mxu1 }
 0x212   : > { %v565_v1 = vadd.f32 %v897_v61, %v564_v0 }
 0x213   : > { %v584_v2 = vmax.f32 %v570_v63, 0.0 }
 0x214   : > { %v583_v3 = vmax.f32 %v565_v1, 0.0  ;;  %v1033_v4 = vpop.f32.mrb[2].mxu1 }
 0x215   : > { %v580_v5 = vadd.f32 %v1033_v4, %v897_v61  ;;  %v574_v6 = vpop.f32.mrb[3].mxu1 }
 0x216   : > { %v933_v7 = vpack.c.bf16 %v584_v2, %v583_v3  ;;  %v575_v8 = vadd.f32 %v897_v61, %v574_v6 }
 0x217   : > { %v586_v9 = vmax.f32 %v580_v5, 0.0 }
 0x218   : > { %934 = vst [vmem:[%s322_s22] sm:$0xff] %v933_v7   ;;  %v585_v10 = vmax.f32 %v575_v8, 0.0 }
 0x21a   : > { %v938_v11 = vpack.c.bf16 %v586_v9, %v585_v10 }
 0x21c   : > { %950 = vst [vmem:[%s322_s22 + $0x8] sm:$0xff] %v938_v11  }
 0x21d   : > { %1259 = shalt.err (!%p1256_p5)
}
 0x21e   : > { %s1260_s28 = scalar_lea.hbm %s1571_s21, 256  ;;  %s1264_s22 = scalar_lea.hbm %s1623_s6, 512 }
 0x21f   : > { %p1261_p6 = scmp.ne.s32.totalorder %s1571_s21, %s1260_s28  ;;  %p1265_p12 = scmp.lt.u32.totalorder %s1571_s21, %s1623_s6 }
 0x220   : > { %p1266_p2 = scmp.lt.u32.totalorder %s1264_s22, %s1260_s28  ;;  %p1268_p4 = scmp.lt.u32.totalorder %s1260_s28, %s1571_s21 }
 0x221   : > { %p1262_p9 = pnand %p1261_p6, %p1638_p1 }
 0x222   : > { %p1267_p3 = por %p1266_p2, %p1265_p12 }
 0x223   : > { %p1263_p10 = pneg %p1262_p9 }
 0x224   : > { %p1269_p7 = por %p1268_p4, %p1267_p3 }
 0x226   : > { %p1270_p8 = pnand %p1269_p7, %p1263_p10 }
 0x228   : > { %1273 = shalt.err (!%p1270_p8)
}
 0x229   : > { %1086 = dma.vmem_to_hbm [thread:$0]  (%p1638_p1), %s1564_s9, 256, %s1571_s21, %s713_s29, %s1330_s10, %s1330_s10, %s1331_s17  }
 0x22a PF: > { %p1108_p11 = scmp.ge.s32.totalorder %s1320_s27, 2  ;;  %s762_s8 = sand.u32 1, %s1308_s24  }
 0x22b   : > { %p1639_p13 = scmp.ne.s32.totalorder %s1630_s12, 0  ;;  %s763_s20 = scalar_lea.sflag [#allocation4], %s762_s8 }
 0x22d   : > { %p1098_p0 = pnand %p1108_p11, %p1639_p13 }
 0x22f   : > { %1299 = dma.done.wait (!%p1098_p0), %s763_s20, 256  }
 0x230   : > { %1301 = vsyncadd (!%p1098_p0), %s763_s20, 4294967040  ;;  %s772_s11 = scalar_lea.sflag [#allocation9], %s762_s8 }
 0x231   : > { %1303 = dma.done.wait (!%p1098_p0), %s772_s11, 256  }
 0x232   : > { %1305 = vsyncadd (!%p1098_p0), %s772_s11, 4294967040  ;;  %s1640_s16 = sld [smem:[#allocation14_spill]]  ;;  %p23_p1 = scmp.ge.s32.totalorder %s1398_s30, 4  }
 0x233   : > { %s1641_s24 = smov %s1312_s25  ;;  %s1642_s25 = smov %s1316_s26 }
 0x234   : > { %s1644_s27 = smov %s1398_s30  ;;  %25 = sbr.rel (!%p23_p1) target bundleno = 7 (0x7), region = 108 }
 0x238   : > { %s1643_s26 = smov %s1640_s16 }
 0x23b   :  { %777 = vsyncpa [#allocation3], 1 }
 0x23c   :  { %779 = vsyncpa [#allocation3 + $0x1], 1 }
 0x23d   :  { %780 = vsyncpa [#allocation6], 1 }
 0x23e   :  { %781 = vsyncpa [#allocation4], 1 }
 0x23f   :  { %783 = vsyncpa [#allocation4 + $0x1], 1 }
 0x240   :  { %784 = vsyncpa [#allocation9], 1 }
 0x241   :  { %786 = vsyncpa [#allocation9 + $0x1], 1 }

</bundles_post_ra>
